<compile_context>
chip_gen: v7x
topology: tpu7x:2x2x1
jax: 0.10.0
libtpu: 0.0.40
codegen_flags: <defaults>
</compile_context>

<pallas_src>
import functools
import math

import jax
import jax.numpy as jnp
from jax import lax
from jax.experimental import pallas as pl
from jax.experimental.pallas import tpu as pltpu


def _round_up(x, m):
    return ((x + m - 1) // m) * m


def _vmem_capacity_bytes():
    try:
        return int(pltpu.get_tpu_info().vmem_capacity_bytes)
    except Exception:
        return 64 << 20   # v7x per-core capacity: safe lower bound.


# ---------------------------------------------------------------------------
# Kernel 1: weight normalization (one shot, hoisted out of the conv grid).
# ---------------------------------------------------------------------------
def _wn_weight_kernel(v_ref, g_ref, w_ref):
    # v_ref: [K, C_out]  direction v, rows ordered (i, j, ci)
    # g_ref: [1, C_out]  magnitude g
    # w_ref: [K, C_out]  g * v / ||v||  (matches PyTorch exactly, including a
    #                    NaN result for an all-zero v column)
    v = v_ref[...]
    norm = jnp.sqrt(jnp.sum(v * v, axis=0, keepdims=True))   # [1, C_out]
    w_ref[...] = v * (g_ref[...] / norm)


# ---------------------------------------------------------------------------
# Kernel 2: conv as ONE fused im2col matmul per (batch, row-band) grid step.
# ---------------------------------------------------------------------------
def _conv_kernel(x_ref, w_ref, b_ref, o_ref, lhs_ref, *, TH, Wo, kh, kw, C_in):
    # x_ref  : [1, Hp, Wp, C_in]  zero-padded NHWC image of batch n (resident,
    #                             single-buffered; re-DMAd only when n changes)
    # w_ref  : [K, C_out]         normalized weight, rows ordered (i, j, ci)
    # b_ref  : [1, C_out]         bias (f32)
    # o_ref  : [1, TH*Wo, C_out]  output row band (contiguous HBM region)
    # lhs_ref: [TH, Wo, K]        VMEM scratch: im2col LHS for this band
    t = pl.program_id(1)
    row0 = t * TH

    # Assemble the im2col LHS from kh*kw static slices of the resident image.
    # Each slice is [TH, Wo, C_in] (W already on sublanes, C_in on lanes), so
    # these are plain static lane-offset stores -- no cross-lane relayout.
    for i in range(kh):
        for j in range(kw):
            c0 = (i * kw + j) * C_in
            lhs_ref[:, :, c0:c0 + C_in] = x_ref[
                0, pl.ds(row0 + i, TH), pl.ds(j, Wo), :]

    # One MXU matmul for the whole band: [TH*Wo, K] x [K, C_out].
    lhs = lhs_ref[...].reshape(TH * Wo, kh * kw * C_in)
    acc = jnp.dot(lhs, w_ref[...], preferred_element_type=jnp.float32)

    # Bias added once per band (not per row); f32 epilogue; single store.
    o_ref[0] = (acc + b_ref[...]).astype(o_ref.dtype)
    # TODO(synk): a transposed variant (w.T @ lhs.T -> [C_out, M]) would emit
    # NCHW directly with lane-dense M stores, at the cost of an in-kernel
    # transpose / transposed dot_general.


# ---------------------------------------------------------------------------
# Tiling helper
# ---------------------------------------------------------------------------
def _pick_row_tile(N, Ho, Wo, Hp_min, Wp, C_in, C_out, K,
                   in_itemsize, out_itemsize, vmem_budget):
    """Largest row band TH (output rows per grid step) that fits the budget."""
    k_l = _round_up(K, 128)
    ci_l = _round_up(C_in, 128)
    co_l = _round_up(C_out, 128)
    # TH-independent, single-buffered resident blocks (+ compiler margin).
    x_res = Hp_min * _round_up(Wp, 8) * ci_l * in_itemsize
    w_res = _round_up(K, 8) * co_l * in_itemsize
    b_res = 8 * co_l * 4
    fixed = x_res + w_res + b_res + (6 << 20)
    # Per output row of the band: im2col scratch + live LHS value, the
    # double-buffered output block, the f32 accumulator, and at most one
    # extra resident padded-image row from rounding Ho up to a TH multiple.
    per_row = (2 * _round_up(Wo, 8) * k_l * in_itemsize
               + 2 * Wo * co_l * out_itemsize
               + Wo * co_l * 4
               + _round_up(Wp, 8) * ci_l * in_itemsize)
    avail = max(vmem_budget - fixed, per_row)
    th = max(1, min(Ho, int(avail // per_row)))
    # v7x megacore: when the batch axis alone cannot feed both TensorCores,
    # keep at least two row bands.
    if N < 2 and Ho > 1:
        th = min(th, pl.cdiv(Ho, 2))
    # Keep (TH * Wo) % 8 == 0 so the band output block stays 8-sublane aligned.
    m = 8 // math.gcd(Wo, 8)
    th = max(m, (th // m) * m)
    return int(th)


# ---------------------------------------------------------------------------
# Wrappers
# ---------------------------------------------------------------------------
def wn_conv2d_nhwc(x_nhwc, v, g, b, padding, use_bf16_matmul=False):
    """Weight-normalized Conv2d, channels-last. Returns [N, Ho, Wo, C_out]."""
    N, H, W, C_in = x_nhwc.shape
    C_out, C_in_w, kh, kw = v.shape
    assert C_in_w == C_in, (C_in_w, C_in)
    assert int(padding) >= 0
    # Implements exactly what the module uses: stride=1, dilation=1, groups=1.
    ph = pw = int(padding)
    Ho = H + 2 * ph - kh + 1
    Wo = W + 2 * pw - kw + 1
    Wp = W + 2 * pw
    K = kh * kw * C_in
    assert Ho >= 1 and Wo >= 1

    # --- weight norm (one-shot Pallas kernel); rows ordered (i, j, ci) to
    # match the per-tap column layout of the im2col LHS in the conv kernel.
    v2 = v.transpose(2, 3, 1, 0).reshape(K, C_out).astype(jnp.float32)
    g2 = g.reshape(1, C_out).astype(jnp.float32)
    b2 = b.reshape(1, C_out).astype(jnp.float32)
    w2 = pl.pallas_call(
        _wn_weight_kernel,
        out_shape=jax.ShapeDtypeStruct((K, C_out), jnp.float32),
    )(v2, g2)

    # --- tiling: budget TH against the real VMEM capacity of this chip.
    compute_dtype = jnp.bfloat16 if use_bf16_matmul else jnp.float32
    in_itemsize = jnp.dtype(compute_dtype).itemsize
    out_itemsize = jnp.dtype(x_nhwc.dtype).itemsize
    vmem_limit = int(0.75 * _vmem_capacity_bytes())
    TH = _pick_row_tile(N, Ho, Wo, H + 2 * ph, Wp, C_in, C_out, K,
                        in_itemsize, out_itemsize, vmem_limit)
    n_bands = pl.cdiv(Ho, TH)
    Ho_pad = n_bands * TH
    Hp = Ho_pad + kh - 1      # extra bottom zero rows cover the last band

    # --- padded NHWC input (no HBM im2col; the pad fuses with the NCHW->NHWC
    # transpose copy in XLA).
    # TODO(synk): for very large images the full padded image no longer fits
    # resident VMEM; block H with a manual halo DMA (pl.ANY + make_async_copy)
    # and/or the lane-dense [N, Hp, Wp*C_in] layout instead.
    xp = jnp.pad(x_nhwc, ((0, 0), (ph, Hp - H - ph), (pw, pw), (0, 0)))
    xp = xp.astype(compute_dtype)
    w2m = w2.astype(compute_dtype)

    cost = pl.CostEstimate(
        flops=2 * N * Ho_pad * Wo * K * C_out,
        transcendentals=0,
        bytes_accessed=int(N * Hp * Wp * C_in * in_itemsize
                           + K * C_out * in_itemsize
                           + N * Ho_pad * Wo * C_out * out_itemsize),
    )

    kernel = functools.partial(_conv_kernel, TH=TH, Wo=Wo, kh=kh, kw=kw,
                               C_in=C_in)

    out = pl.pallas_call(
        kernel,
        out_shape=jax.ShapeDtypeStruct((N, Ho_pad * Wo, C_out), x_nhwc.dtype),
        grid=(N, n_bands),
        in_specs=[
            # padded image of batch n: resident across the band axis,
            # single-buffered (re-DMAd only when n changes).
            pl.BlockSpec((1, Hp, Wp, C_in), lambda n, t: (n, 0, 0, 0),
                         pipeline_mode=pl.Buffered(1)),
            # normalized weight / bias: constant over the whole grid.
            pl.BlockSpec((K, C_out), lambda n, t: (0, 0),
                         pipeline_mode=pl.Buffered(1)),
            pl.BlockSpec((1, C_out), lambda n, t: (0, 0),
                         pipeline_mode=pl.Buffered(1)),
        ],
        out_specs=pl.BlockSpec((1, TH * Wo, C_out), lambda n, t: (n, t, 0)),
        scratch_shapes=[pltpu.VMEM((TH, Wo, K), compute_dtype)],
        compiler_params=pltpu.CompilerParams(
            dimension_semantics=("parallel", "parallel"),
            vmem_limit_bytes=vmem_limit,
        ),
        cost_estimate=cost,
    )(xp, w2m, b2)

    return out.reshape(N, Ho_pad, Wo, C_out)[:, :Ho]


def wn_conv2d(x, v, g, b, padding, use_bf16_matmul=False):
    """NCHW in / NCHW out, matching the PyTorch module (layout glue only)."""
    y = wn_conv2d_nhwc(x.transpose(0, 2, 3, 1), v, g, b, padding,
                       use_bf16_matmul=use_bf16_matmul)
    return y.transpose(0, 3, 1, 2)


def _reference(x, v, g, b, padding):
    """Pure-JAX reference matching PyTorch weight_norm + Conv2d."""
    norm = jnp.sqrt(jnp.sum(v * v, axis=(1, 2, 3), keepdims=True))
    w = g * v / norm
    y = lax.conv_general_dilated(
        x, w, window_strides=(1, 1),
        padding=((padding, padding), (padding, padding)),
        dimension_numbers=("NCHW", "OIHW", "NCHW"))
    return y + b.reshape(1, -1, 1, 1)


if __name__ == "__main__":
    # WNConv2d(in_channel=4, mid_channel=8, kernel=3, padding=1, bias=True)
    in_channel, mid_channel, kernel, padding = 4, 8, 3, 1
    N, H, W = 2, 16, 16

    key = jax.random.PRNGKey(0)
    kx, kv, kg, kb = jax.random.split(key, 4)
    x = jax.random.normal(kx, (N, in_channel, H, W), dtype=jnp.float32)
    v = jax.random.normal(kv, (mid_channel, in_channel, kernel, kernel),
                          dtype=jnp.float32) * 0.1
    g = jax.random.normal(kg, (mid_channel, 1, 1, 1), dtype=jnp.float32)
    b = jax.random.normal(kb, (mid_channel,), dtype=jnp.float32) * 0.1

    y = wn_conv2d(x, v, g, b, padding)
    y = jax.block_until_ready(y)

    y_ref = _reference(x, v, g, b, padding)
    assert y.shape == (N, mid_channel, H, W), y.shape
    assert jnp.allclose(y, y_ref, atol=1e-4, rtol=1e-4), float(
        jnp.max(jnp.abs(y - y_ref)))

    print("KERNEL_OK")
</pallas_src>

<mosaic_0001>
module attributes {stable_mosaic.version = 11 : i64} {
  func.func @_wn_weight_kernel(%arg0: memref<36x8xf32, #tpu.memory_space<vmem>>, %arg1: memref<1x8xf32, #tpu.memory_space<vmem>>, %arg2: memref<36x8xf32, #tpu.memory_space<vmem>>) attributes {dimension_semantics = [], scalar_prefetch = 0 : i64, scratch_operands = 0 : i64, tpu.core_type = #tpu.core_type<tc>} {
    %c0 = arith.constant 0 : index
    %c0_0 = arith.constant 0 : index
    %0 = vector.load %arg0[%c0, %c0_0] : memref<36x8xf32, #tpu.memory_space<vmem>>, vector<36x8xf32>
    %1 = arith.mulf %0, %0 : vector<36x8xf32>
    %cst = arith.constant dense<0.000000e+00> : vector<8xf32>
    %2 = vector.multi_reduction <add>, %1, %cst [0] : vector<36x8xf32> to vector<8xf32>
    %3 = vector.shape_cast %2 : vector<8xf32> to vector<1x8xf32>
    %4 = math.sqrt %3 : vector<1x8xf32>
    %c0_1 = arith.constant 0 : index
    %c0_2 = arith.constant 0 : index
    %5 = vector.load %arg1[%c0_1, %c0_2] : memref<1x8xf32, #tpu.memory_space<vmem>>, vector<1x8xf32>
    %6 = arith.divf %5, %4 : vector<1x8xf32>
    %7 = vector.broadcast %6 : vector<1x8xf32> to vector<36x8xf32>
    %8 = arith.mulf %0, %7 : vector<36x8xf32>
    %c0_3 = arith.constant 0 : index
    %c0_4 = arith.constant 0 : index
    %9 = vector.load %arg2[%c0_3, %c0_4] : memref<36x8xf32, #tpu.memory_space<vmem>>, vector<36x8xf32>
    tpu.vector_store %arg2[%c0_3, %c0_4], %8 {strides = array<i32>} : memref<36x8xf32, #tpu.memory_space<vmem>>, vector<36x8xf32>,
    return
  }
}

</mosaic_0001>

<bundles_post_ra>
// kernel: tpu_custom_call.1
= control target key start
LH: loop header
LB: loop body
LE: loop exit
PB: predicated region body
PF: predicated region fallthrough
CT: control target
= control target key end

     0   :  { %vm21_vm0 = vcmask 64512   ;;  %vm29_vm1 = vcmask 60416   ;;  %v49_v30 = vlaneseq  ;;  %s130_s0 = inlined_call_operand.vmem [shape: f32[36,8], index: 0, kind: input, shape index: {}]   ;;  %s131_s1 = inlined_call_operand.vmem [shape: f32[1,8], index: 1, kind: input, shape index: {}]   ;;  %s132_s2 = inlined_call_operand.vmem [shape: f32[36,8], index: 2, kind: output, shape index: {}]  }
   0x1   :  { %v11_v0 = vld [vmem:[%s130_s0] sm:$0xff]  ;;  %v12_v1 = vld [vmem:[%s130_s0 + $0x8] sm:$0xff]  ;;  %v13_v2 = vld [vmem:[%s130_s0 + $0x10] sm:$0xff] }
   0x2   :  { %v14_v3 = vld [vmem:[%s130_s0 + $0x18] sm:$0xff]  ;;  %v15_v4 = vld [vmem:[%s130_s0 + $0x20] sm:$0xf]  ;;  %v16_v5 = vmul.f32 %v11_v0, %v11_v0  ;;  %v17_v6 = vmul.f32 %v12_v1, %v12_v1  ;;  %v18_v7 = vmul.f32 %v13_v2, %v13_v2  ;;  %v50_v31 = vshrl.u32 %v49_v30, 7 }
   0x3   :  { %v19_v8 = vmul.f32 %v14_v3, %v14_v3  ;;  %v20_v9 = vmul.f32 %v15_v4, %v15_v4  ;;  %v45_v32 = vld [vmem:[%s131_s1] sm:$0x1] }
   0x4   :  { %v22_v10 = vsel %vm21_vm0, %v16_v5, 0.0  ;;  %v23_v11 = vsel %vm21_vm0, %v17_v6, 0.0  ;;  %v25_v12 = vsel %vm21_vm0, %v18_v7, 0.0  ;;  %v51_v33 = vsub.s32 0, %v50_v31 }
   0x5   :  { %v24_v13 = vadd.f32 %v23_v11, %v22_v10  ;;  %v27_v14 = vsel %vm21_vm0, %v19_v8, 0.0  ;;  %v30_v16 = vsel %vm29_vm1, %v20_v9, 0.0 }
   0x7   :  { %v26_v15 = vadd.f32 %v25_v12, %v24_v13 }
   0x9   :  { %v28_v17 = vadd.f32 %v27_v14, %v26_v15 }
   0xb   :  { %v31_v18 = vadd.f32 %v30_v16, %v28_v17 }
   0xd   :  { %v32_v19 = vrot.slane %v31_v18, 4 }
   0xf   :  { %v33_v20 = vadd.f32 %v32_v19, %v31_v18 }
  0x11   :  { %v34_v21 = vrot.slane %v33_v20, 2 }
  0x13   :  { %v35_v22 = vadd.f32 %v34_v21, %v33_v20 }
  0x15   :  { %v36_v23 = vrot.slane %v35_v22, 1 }
  0x17   :  { %v37_v24 = vadd.f32 %v36_v23, %v35_v22 }
  0x19   :  { %68 = vrsqrt.f32 %v37_v24  ;;  %vm40_vm2 = vcmp.eq.f32.partialorder %v37_v24, inf  ;;  %v43_v26 = vand.u32 2147483648, %v37_v24  ;;  %vm42_vm3 = vcmp.eq.f32.partialorder %v37_v24, 0.0 }
  0x23   :  { %v69_v25 = vpop.eup %68 }
  0x24   :  { %v39_v27 = vmul.f32 %v69_v25, %v37_v24 }
  0x26   :  { %v41_v28 = vsel %vm40_vm2, %v37_v24, %v39_v27 }
  0x27   :  { %v44_v29 = vsel %vm42_vm3, %v43_v26, %v41_v28 }
  0x28   :  { %70 = vrcp.f32 %v44_v29 }
  0x32   :  { %v71_v34 = vpop.eup %70 }
  0x33   :  { %v47_v35 = vmul.f32 %v71_v34, %v45_v32 }
  0x35   :  { %v52_v36 = vrot.slane %v47_v35, %v51_v33 }
  0x37   :  { %v54_v37 = vmul.f32 %v52_v36, %v11_v0  ;;  %v55_v38 = vmul.f32 %v52_v36, %v12_v1  ;;  %v56_v39 = vmul.f32 %v52_v36, %v13_v2  ;;  %v57_v40 = vmul.f32 %v52_v36, %v14_v3 }
  0x38   :  { %v58_v41 = vmul.f32 %v52_v36, %v15_v4 }
  0x39   :  { %59 = vst.msk [vmem:[%s132_s2] sm:$0xff] %vm21_vm0, %v54_v37  ;;  %60 = vst.msk [vmem:[%s132_s2 + $0x8] sm:$0xff] %vm21_vm0, %v55_v38 }
  0x3a   :  { %61 = vst.msk [vmem:[%s132_s2 + $0x10] sm:$0xff] %vm21_vm0, %v56_v39  ;;  %62 = vst.msk [vmem:[%s132_s2 + $0x18] sm:$0xff] %vm21_vm0, %v57_v40 }
  0x3b   :  { %63 = vst.msk [vmem:[%s132_s2 + $0x20] sm:$0xf] %vm29_vm1, %v58_v41 }

</bundles_post_ra>
